<compile_context>
chip_gen: v7x
topology: tpu7x:2x2x1
jax: 0.10.0
libtpu: 0.0.40
codegen_flags: <defaults>
</compile_context>

<pallas_src>
import math

import jax
import jax.numpy as jnp
from jax.experimental import pallas as pl
from jax.experimental.pallas import tpu as pltpu


def _cdiv(a, b):
    return -(-a // b)


def _bcast_mul_kernel(x_ref, s_ref, o_ref):
    # x_ref: (TM, L) tile in its native dtype; s_ref: (1, L) scale row already
    # in the output dtype; o_ref: (TM, L) output tile.  Cast happens in-register.
    o_ref[...] = x_ref[...].astype(o_ref.dtype) * s_ref[...]


def weight_mul(x, weight, *, tile_bytes=8 << 20, lane_cap=3840,
               min_pallas_bytes=1 << 20, force_pallas=False):
    """Computes `weight * x` with literal trailing-axis broadcasting.

    weight: (K,) ;  requires x.shape[-1] == K (same restriction as torch).
    """
    assert weight.ndim == 1
    K = int(weight.shape[-1])
    if x.shape[-1] != K:
        raise ValueError(
            f"weight of length {K} broadcasts against the last axis of x; "
            f"got x.shape={x.shape} (same restriction as the torch forward).")

    out_dtype = jnp.result_type(x.dtype, weight.dtype)

    # Tiny-input fast path: pallas_call launch/per-step overhead dwarfs the
    # data movement; XLA's fused elementwise op wins. (Tests force Pallas.)
    nbytes = x.size * jnp.dtype(x.dtype).itemsize
    if not force_pallas and nbytes < min_pallas_bytes:
        return weight.astype(out_dtype) * x.astype(out_dtype)

    # ---- choose a lane-dense width L: always a multiple of lcm(K, 128) ----
    T = x.size
    L_base = math.lcm(K, 128)                 # 384 for K=3
    max_c = max(1, lane_cap // L_base)        # cap L at ~lane_cap lanes

    if T % L_base == 0:
        # No padding needed: pick the largest L = L_base*c (c | T/L_base, <= cap).
        n = T // L_base
        c = 1
        for cand in range(min(n, max_c), 0, -1):
            if n % cand == 0:
                c = cand
                break
        L = L_base * c
        pad = 0
    else:
        # Awkward total size: pad the flat view up to a multiple of L.
        c = max(1, min(max_c, _cdiv(T, L_base)))
        L = L_base * c
        pad = (-T) % L

    T_pad = T + pad
    R = T_pad // L

    x_flat = x.reshape(-1)                    # layout-preserving reshape
    if pad:
        x_flat = jnp.pad(x_flat, (0, pad))    # rare fallback; sliced off below
    x2 = x_flat.reshape(R, L)                 # native dtype, no up-cast copy

    # Scale row: weight tiled across the L lanes (L % K == 0 so the repeat
    # pattern matches flat_index % K).  Tiny, so casting here is free.
    scale_row = jnp.tile(weight.astype(out_dtype), L // K).reshape(1, L)

    # ---- row-tile sizing ----
    in_item = jnp.dtype(x.dtype).itemsize
    out_item = jnp.dtype(out_dtype).itemsize
    item = max(in_item, out_item)
    # Sublane tile of the narrowest dtype involved (f32:8, bf16:16, int8/fp8:32).
    sub = max(8, 32 // min(in_item, out_item))

    rows_per_tile = max(sub, (tile_bytes // (L * item)) // sub * sub)
    if R <= sub:
        tm = R                                # full extent (block == array dim)
    else:
        # Keep the grid >= 2 (>= 4 when there is enough work) so both v7x
        # TensorCores get shards and DMA/compute pipelining stays active.
        min_steps = 4 if R >= 4 * sub else 2
        cap = max(sub, (_cdiv(R, min_steps) // sub) * sub)
        tm = min(rows_per_tile, cap)
    grid = (_cdiv(R, tm),)

    out2 = pl.pallas_call(
        _bcast_mul_kernel,
        out_shape=jax.ShapeDtypeStruct((R, L), out_dtype),
        grid=grid,
        in_specs=[
            pl.BlockSpec((tm, L), lambda i: (i, 0)),   # x tile (native dtype)
            pl.BlockSpec((1, L), lambda i: (0, 0)),    # scale row (resident)
        ],
        out_specs=pl.BlockSpec((tm, L), lambda i: (i, 0)),
        compiler_params=pltpu.CompilerParams(
            dimension_semantics=("parallel",),          # megacore-shardable
            vmem_limit_bytes=52 * 1024 * 1024,          # < v7x 64 MiB per-TC
        ),
    )(x2, scale_row)

    out_flat = out2.reshape(-1)
    if pad:
        out_flat = out_flat[:T]
    return out_flat.reshape(x.shape)


if __name__ == "__main__":
    key = jax.random.PRNGKey(0)
    k1, k2 = jax.random.split(key)

    # Small shape consistent with the module: weight has length 3 and
    # broadcasts against the LAST axis of x1, so x1.shape[-1] = 3.
    x1 = jax.random.normal(k1, (2, 4, 16, 3), dtype=jnp.float32)

    # Parameter init matching torch.ones(3).
    weight = jnp.ones((3,), dtype=jnp.float32)

    out = weight_mul(x1, weight, force_pallas=True)
    out = jax.block_until_ready(out)
    expected = weight * x1                      # literal broadcast reference
    assert out.shape == expected.shape
    assert jnp.allclose(out, expected, atol=1e-6, rtol=1e-6)

    # Non-trivial scale to actually exercise the broadcast path.
    w2 = jnp.array([0.5, -1.25, 2.0], dtype=jnp.float32)
    out2 = jax.block_until_ready(weight_mul(x1, w2, force_pallas=True))
    assert jnp.allclose(out2, w2 * x1, atol=1e-6, rtol=1e-6)

    # Mixed dtype: exercises the in-kernel cast (bf16 input, f32 weight/output).
    x_bf16 = x1.astype(jnp.bfloat16)
    out3 = jax.block_until_ready(weight_mul(x_bf16, w2, force_pallas=True))
    ref3 = w2 * x_bf16.astype(jnp.float32)
    assert out3.dtype == jnp.float32
    assert jnp.allclose(out3, ref3, atol=1e-3, rtol=1e-3)

    # Awkward total size (not divisible by lcm(K,128)): exercises the pad path.
    x3 = jax.random.normal(k2, (5, 7, 3), dtype=jnp.float32)
    out4 = jax.block_until_ready(weight_mul(x3, w2, force_pallas=True))
    assert jnp.allclose(out4, w2 * x3, atol=1e-6, rtol=1e-6)

    print("KERNEL_OK")
</pallas_src>

<mosaic_0001>
module attributes {stable_mosaic.version = 11 : i64} {
  func.func @_bcast_mul_kernel(%arg0: i32, %arg1: memref<1x384xf32, #tpu.memory_space<vmem>>, %arg2: memref<1x384xf32, #tpu.memory_space<vmem>>, %arg3: memref<1x384xf32, #tpu.memory_space<vmem>>) attributes {dimension_semantics = [#tpu.dimension_semantics<parallel>], iteration_bounds = array<i64: 1>, scalar_prefetch = 0 : i64, scratch_operands = 0 : i64, tpu.core_type = #tpu.core_type<tc>, window_params = [{transform_indices = @transform_0, window_bounds = array<i64: 1, 384>}, {pipeline_mode = #tpu.pipeline_mode<synchronous>, transform_indices = @transform_1, window_bounds = array<i64: 1, 384>}, {transform_indices = @transform_2, window_bounds = array<i64: 1, 384>}]} {
    %c0 = arith.constant 0 : index
    %c0_0 = arith.constant 0 : index
    %0 = vector.load %arg1[%c0, %c0_0] : memref<1x384xf32, #tpu.memory_space<vmem>>, vector<1x384xf32>
    %c0_1 = arith.constant 0 : index
    %c0_2 = arith.constant 0 : index
    %1 = vector.load %arg2[%c0_1, %c0_2] : memref<1x384xf32, #tpu.memory_space<vmem>>, vector<1x384xf32>
    %2 = arith.mulf %0, %1 : vector<1x384xf32>
    %c0_3 = arith.constant 0 : index
    %c0_4 = arith.constant 0 : index
    %3 = vector.load %arg3[%c0_3, %c0_4] : memref<1x384xf32, #tpu.memory_space<vmem>>, vector<1x384xf32>
    tpu.vector_store %arg3[%c0_3, %c0_4], %2 {strides = array<i32>} : memref<1x384xf32, #tpu.memory_space<vmem>>, vector<1x384xf32>,
    return
  }
  func.func @transform_0(%arg0: i32) -> (i32, i32) {
    %c0_i32 = arith.constant 0 : i32
    %c0_i32_0 = arith.constant 0 : i32
    return %arg0, %c0_i32 : i32, i32
  }
  func.func @transform_1(%arg0: i32) -> (i32, i32) {
    %c0_i32 = arith.constant 0 : i32
    %c0_i32_0 = arith.constant 0 : i32
    %c0_i32_1 = arith.constant 0 : i32
    return %c0_i32, %c0_i32_0 : i32, i32
  }
  func.func @transform_2(%arg0: i32) -> (i32, i32) {
    %c0_i32 = arith.constant 0 : i32
    %c0_i32_0 = arith.constant 0 : i32
    return %arg0, %c0_i32 : i32, i32
  }
}

</mosaic_0001>

<bundles_post_ra>
// kernel: tpu_custom_call.1
= control target key start
LH: loop header
LB: loop body
LE: loop exit
PB: predicated region body
PF: predicated region fallthrough
CT: control target
= control target key end

     0   :  { %7 = vsyncpa [#allocation3], 0  ;;  %s141_s0 = inlined_call_operand.hbm [shape: f32[1,384], index: 0, kind: input, shape index: {}]   ;;  %s142_s1 = inlined_call_operand.vmem [shape: f32[1,384], index: 1, kind: input, shape index: {}]   ;;  %s143_s2 = inlined_call_operand.hbm [shape: f32[1,384], index: 2, kind: output, shape index: {}]  }
   0x1   :  { %8 = vsyncpa [#allocation4], 0  ;;  %s97_s9 = smov [#allocation2]   ;;  %s49_s13 = scalar_lea.hbm %s141_s0, 48 }
   0x2   :  { %s15_s10 = sshll.u32 %s97_s9, 4  ;;  %p50_p0 = scmp.ne.s32.totalorder %s141_s0, %s49_s13  ;;  %s16_s10 = int_to_ptr.vmem [resolvable:$true] %s15_s10 }
   0x3   :  { %p53_p1 = scmp.lt.u32.totalorder %s49_s13, %s141_s0 }
   0x5   :  { %p55_p2 = pnand %p53_p1, %p50_p0 }
   0x7   :  { %58 = shalt.err (!%p55_p2)
}
   0x8   :  { %s59_s18 = scalar_lea.vmem %s16_s10, 48  ;;  %s63_s19 = scalar_lea.vmem %s16_s10, 64 }
   0x9   :  { %p60_p3 = scmp.ne.s32.totalorder %s16_s10, %s59_s18  ;;  %p64_p4 = scmp.lt.s32.totalorder %s16_s10, %s16_s10 }
   0xa   :  { %p65_p5 = scmp.lt.s32.totalorder %s63_s19, %s59_s18 }
   0xc   :  { %p66_p6 = por %p65_p5, %p64_p4 }
   0xe   :  { %p67_p7 = pnand %p66_p6, %p60_p3 }
  0x10   :  { %70 = shalt.err (!%p67_p7)
}
  0x11   :  { %18 = dma.hbm_to_vmem [thread:$0]  %s141_s0, 48, %s16_s10, [#allocation3]  }
  0x12   :  { %93 = dma.done.wait [#allocation3], 48  }
  0x13   :  { %94 = vsyncadd [#allocation3], 4294967248  ;;  %v27_v0 = vlaneseq  ;;  %s98_s22 = smov [#allocation5]   ;;  %v24_v1 = vld [vmem:[#allocation2] sm:$0x7] }
  0x14   :  { %s38_s23 = sshll.u32 %s98_s22, 4  ;;  %v25_v2 = vld [vmem:[%s142_s1] sm:$0x7]  ;;  %s39_s23 = int_to_ptr.vmem [resolvable:$true] %s38_s23 }
  0x15   :  { %vm29_vm0 = vcmp.lt.s32.totalorder %v27_v0, 384  ;;  %v26_v3 = vmul.f32 %v25_v2, %v24_v1  ;;  %s71_s26 = scalar_lea.vmem %s39_s23, 48  ;;  %s75_s27 = scalar_lea.vmem %s39_s23, 64 }
  0x16   :  { %p72_p8 = scmp.ne.s32.totalorder %s39_s23, %s71_s26  ;;  %p76_p9 = scmp.lt.s32.totalorder %s39_s23, %s39_s23 }
  0x17   :  { %31 = vst.msk [vmem:[#allocation5] sm:$0x7] %vm29_vm0, %v26_v3  ;;  %p77_p10 = scmp.lt.s32.totalorder %s75_s27, %s71_s26 }
  0x19   :  { %p78_p11 = por %p77_p10, %p76_p9 }
  0x1b   :  { %p79_p12 = pnand %p78_p11, %p72_p8 }
  0x1d   :  { %82 = shalt.err (!%p79_p12)
}
  0x1e   :  { %s83_s29 = scalar_lea.hbm %s143_s2, 48 }
  0x1f   :  { %p84_p13 = scmp.ne.s32.totalorder %s143_s2, %s83_s29  ;;  %p87_p0 = scmp.lt.u32.totalorder %s83_s29, %s143_s2 }
  0x21   :  { %p89_p1 = pnand %p87_p0, %p84_p13 }
  0x23   :  { %92 = shalt.err (!%p89_p1)
}
  0x24   :  { %41 = dma.vmem_to_hbm [thread:$0]  %s39_s23, 48, %s143_s2, [#allocation4]  }
  0x25   :  { %95 = dma.done.wait [#allocation4], 48  }
  0x26   :  { %96 = vsyncadd [#allocation4], 4294967248 }
  0x27   :  { %45 = vsyncpa [#allocation3], 1 }
  0x28   :  { %46 = vsyncpa [#allocation4], 1 }

</bundles_post_ra>
